<compile_context>
chip_gen: v7x
topology: tpu7x:2x2x1
jax: 0.10.0
libtpu: 0.0.40
codegen_flags: <defaults>
</compile_context>

<pallas_src>
import jax
import jax.numpy as jnp
from jax.experimental import pallas as pl
from jax.experimental.pallas import tpu as pltpu


# ----------------------------------------------------------------------------
# Single fused kernel: conv1+ReLU+pool -> conv2+ReLU+pool -> fc1+ReLU -> fc2
# ----------------------------------------------------------------------------
def _cnn_kernel(xcat_ref, w1_ref, b1_ref, w2_ref, b2_ref,
                wf1_ref, bf1_ref, wf2_ref, bf2_ref, o_ref,
                s1_ref, s2_ref):
    f32 = jnp.float32
    n1, c1 = s1_ref.shape          # (B*L, 16)
    n2, c2 = s2_ref.shape          # (B*L/2, 32)
    bsz = o_ref.shape[0]           # B
    l2 = n2 // bsz                 # L/2 (length after pool1)
    l4 = l2 // 2                   # L/4 (length after pool2)

    # ---- conv1 + bias + ReLU: ONE matmul on the wrapper-built im2col input ----
    y1 = jnp.dot(xcat_ref[...], w1_ref[...], preferred_element_type=f32)
    y1 = jnp.maximum(y1 + b1_ref[...], 0.0)                      # (B*L, 16)

    # ---- MaxPool1d(2): even/odd sublane-strided reads + VPU max (no MXU) ----
    s1_ref[...] = y1
    h1 = jnp.maximum(s1_ref[pl.ds(0, n2, 2), :],
                     s1_ref[pl.ds(1, n2, 2), :])                 # (B*L/2, 16)

    # ---- conv2 + bias + ReLU: in-kernel im2col (roll + batch-boundary mask),
    #      then ONE matmul against the (3*16, 32) weight ----
    pos = jax.lax.broadcasted_iota(jnp.int32, (n2, c1), 0) % l2  # within-batch position
    prev = jnp.where(pos == 0, 0.0, pltpu.roll(h1, shift=1, axis=0))        # h1[r-1]
    nxt = jnp.where(pos == l2 - 1, 0.0, pltpu.roll(h1, shift=n2 - 1, axis=0))  # h1[r+1]
    h1cat = jnp.concatenate([prev, h1, nxt], axis=1)             # (B*L/2, 48)
    y2 = jnp.dot(h1cat, w2_ref[...], preferred_element_type=f32)
    y2 = jnp.maximum(y2 + b2_ref[...], 0.0)                      # (B*L/2, 32)

    # ---- MaxPool1d(2) fused with the flatten gather: for each pooled position
    #      l a strided read picks that row for every batch element ----
    s2_ref[...] = y2
    pieces = []
    for l in range(l4):
        ev = s2_ref[pl.ds(2 * l, bsz, l2), :]                    # (B, 32)
        od = s2_ref[pl.ds(2 * l + 1, bsz, l2), :]
        pieces.append(jnp.maximum(ev, od))
    hflat = pieces[0] if l4 == 1 else jnp.concatenate(pieces, axis=1)   # (B, (L/4)*32)

    # ---- fc1 + ReLU (PyTorch channel-major flatten baked into wf1 layout) ----
    h = jnp.dot(hflat, wf1_ref[...], preferred_element_type=f32)
    h = jnp.maximum(h + bf1_ref[...], 0.0)                       # (B, 64)
    # TODO(synk): nn.Dropout(0.2) is the identity in eval/inference mode; omitted.

    # ---- fc2 ----
    out = jnp.dot(h, wf2_ref[...], preferred_element_type=f32) + bf2_ref[...]
    o_ref[...] = out.astype(o_ref.dtype)


# ----------------------------------------------------------------------------
# Parameter init (PyTorch-shaped, then converted to the kernel layout)
# ----------------------------------------------------------------------------
def init_params(key, input_channels, sequence_length, output_size):
    feature = sequence_length // 4
    ks = jax.random.split(key, 8)
    scale = 0.1
    # PyTorch shapes
    conv1_w = scale * jax.random.normal(ks[0], (16, input_channels, 3), jnp.float32)
    conv1_b = scale * jax.random.normal(ks[1], (16,), jnp.float32)
    conv2_w = scale * jax.random.normal(ks[2], (32, 16, 3), jnp.float32)
    conv2_b = scale * jax.random.normal(ks[3], (32,), jnp.float32)
    fc1_w = scale * jax.random.normal(ks[4], (64, 32 * feature), jnp.float32)
    fc1_b = scale * jax.random.normal(ks[5], (64,), jnp.float32)
    fc2_w = scale * jax.random.normal(ks[6], (output_size, 64), jnp.float32)
    fc2_b = scale * jax.random.normal(ks[7], (output_size,), jnp.float32)

    # conv (O, C, K) -> (K*C, O): row index k*Cin + c matches the im2col lane order.
    w1 = jnp.transpose(conv1_w, (2, 1, 0)).reshape(3 * input_channels, 16)
    w2 = jnp.transpose(conv2_w, (2, 1, 0)).reshape(3 * 16, 32)
    # fc1 (H, 32*feat) with feature index c*feat + l  ->  (feat*32, H) with row
    # index l*32 + c, matching the kernel's (l, c)-ordered lane concat.
    wf1 = jnp.transpose(fc1_w.T.reshape(32, feature, 64), (1, 0, 2)).reshape(feature * 32, 64)
    return {
        "w1": w1, "b1": conv1_b.reshape(1, 16),
        "w2": w2, "b2": conv2_b.reshape(1, 32),
        "wf1": wf1, "bf1": fc1_b.reshape(1, 64),
        "wf2": fc2_w.T, "bf2": fc2_b.reshape(1, output_size),
    }


# ----------------------------------------------------------------------------
# Forward pass: one fused pallas_call (built once per shape under jit)
# ----------------------------------------------------------------------------
@jax.jit
def cnn_forward(x_ncl, params):
    B, Cin, L = x_ncl.shape
    O = params["bf2"].shape[-1]
    assert L % 4 == 0

    # NCL -> NLC, then mini im2col for conv1 (kernel_size=3, padding=1):
    # lane order (tap k, channel c) = k*Cin + c, matching w1's row order.
    x_nlc = jnp.transpose(x_ncl, (0, 2, 1))                            # (B, L, Cin)
    prev = jnp.pad(x_nlc[:, :-1, :], ((0, 0), (1, 0), (0, 0)))         # x[l-1], 0 at l=0
    nxt = jnp.pad(x_nlc[:, 1:, :], ((0, 0), (0, 1), (0, 0)))           # x[l+1], 0 at l=L-1
    x_cat = jnp.concatenate([prev, x_nlc, nxt], axis=2).reshape(B * L, 3 * Cin)

    vmem = pl.BlockSpec(memory_space=pltpu.MemorySpace.VMEM)
    call = pl.pallas_call(
        _cnn_kernel,
        out_shape=jax.ShapeDtypeStruct((B, O), jnp.float32),
        in_specs=[vmem] * 9,
        out_specs=vmem,
        scratch_shapes=[pltpu.VMEM((B * L, 16), jnp.float32),       # pool1 staging
                        pltpu.VMEM((B * L // 2, 32), jnp.float32)], # pool2/flatten staging
    )
    return call(x_cat, params["w1"], params["b1"], params["w2"], params["b2"],
                params["wf1"], params["bf1"], params["wf2"], params["bf2"])


if __name__ == "__main__":
    key = jax.random.PRNGKey(0)
    k_x, k_p = jax.random.split(key)

    # Small shapes consistent with the module: batch=2, channels=1, seq_len=8
    B, Cin, L, out_size = 2, 1, 8, 1
    x = jax.random.normal(k_x, (B, Cin, L), jnp.float32)     # NCL, like PyTorch
    params = init_params(k_p, Cin, L, out_size)

    out = cnn_forward(x, params)
    jax.block_until_ready(out)
    assert out.shape == (B, out_size) and out.dtype == jnp.float32
    print("KERNEL_OK")
</pallas_src>

<mosaic_0001>
module attributes {stable_mosaic.version = 11 : i64} {
  func.func @_cnn_kernel(%arg0: memref<16x3xf32, #tpu.memory_space<vmem>>, %arg1: memref<3x16xf32, #tpu.memory_space<vmem>>, %arg2: memref<1x16xf32, #tpu.memory_space<vmem>>, %arg3: memref<48x32xf32, #tpu.memory_space<vmem>>, %arg4: memref<1x32xf32, #tpu.memory_space<vmem>>, %arg5: memref<64x64xf32, #tpu.memory_space<vmem>>, %arg6: memref<1x64xf32, #tpu.memory_space<vmem>>, %arg7: memref<64x1xf32, #tpu.memory_space<vmem>>, %arg8: memref<1x1xf32, #tpu.memory_space<vmem>>, %arg9: memref<2x1xf32, #tpu.memory_space<vmem>>, %arg10: memref<16x16xf32, #tpu.memory_space<vmem>>, %arg11: memref<8x32xf32, #tpu.memory_space<vmem>>) attributes {dimension_semantics = [], scalar_prefetch = 0 : i64, scratch_operands = 2 : i64, tpu.core_type = #tpu.core_type<tc>} {
    %c0 = arith.constant 0 : index
    %c0_0 = arith.constant 0 : index
    %0 = vector.load %arg0[%c0, %c0_0] : memref<16x3xf32, #tpu.memory_space<vmem>>, vector<16x3xf32>
    %c0_1 = arith.constant 0 : index
    %c0_2 = arith.constant 0 : index
    %1 = vector.load %arg1[%c0_1, %c0_2] : memref<3x16xf32, #tpu.memory_space<vmem>>, vector<3x16xf32>
    %cst = arith.constant dense<0.000000e+00> : vector<16x16xf32>
    %2 = tpu.matmul %0, %1, %cst {dimension_numbers = #tpu.dot_dimension_numbers<[1], [0], [0], [1], [0, 0, 1, 1], [], []>} : vector<16x3xf32>, vector<3x16xf32>, vector<16x16xf32> -> vector<16x16xf32>
    %c0_3 = arith.constant 0 : index
    %c0_4 = arith.constant 0 : index
    %3 = vector.load %arg2[%c0_3, %c0_4] : memref<1x16xf32, #tpu.memory_space<vmem>>, vector<1x16xf32>
    %4 = vector.broadcast %3 : vector<1x16xf32> to vector<16x16xf32>
    %5 = arith.addf %2, %4 : vector<16x16xf32>
    %cst_5 = arith.constant 0.000000e+00 : f32
    %6 = vector.broadcast %cst_5 : f32 to vector<16x16xf32>
    %7 = arith.maximumf %5, %6 : vector<16x16xf32>
    %c0_6 = arith.constant 0 : index
    %c0_7 = arith.constant 0 : index
    %8 = vector.load %arg10[%c0_6, %c0_7] : memref<16x16xf32, #tpu.memory_space<vmem>>, vector<16x16xf32>
    tpu.vector_store %arg10[%c0_6, %c0_7], %7 {strides = array<i32>} : memref<16x16xf32, #tpu.memory_space<vmem>>, vector<16x16xf32>,
    %c0_8 = arith.constant 0 : index
    %c0_9 = arith.constant 0 : index
    %9 = tpu.strided_load %arg10[%c0_8, %c0_9] {strides = array<i32: 2, 1>} : memref<16x16xf32, #tpu.memory_space<vmem>>, vector<8x16xf32>
    %c1 = arith.constant 1 : index
    %c0_10 = arith.constant 0 : index
    %10 = tpu.strided_load %arg10[%c1, %c0_10] {strides = array<i32: 2, 1>} : memref<16x16xf32, #tpu.memory_space<vmem>>, vector<8x16xf32>
    %11 = arith.maximumf %9, %10 : vector<8x16xf32>
    %12 = tpu.iota {dimensions = array<i32: 0>} : vector<8x16xi32>
    %c4_i32 = arith.constant 4 : i32
    %c0_i32 = arith.constant 0 : i32
    %13 = arith.cmpi eq, %c4_i32, %c0_i32 : i32
    %c1_i32 = arith.constant 1 : i32
    %14 = arith.select %13, %c1_i32, %c4_i32 : i32
    %15 = vector.broadcast %14 : i32 to vector<8x16xi32>
    %16 = arith.remsi %12, %15 : vector<8x16xi32>
    %c0_i32_11 = arith.constant 0 : i32
    %17 = vector.broadcast %c0_i32_11 : i32 to vector<8x16xi32>
    %18 = arith.cmpi ne, %16, %17 : vector<8x16xi32>
    %c0_i32_12 = arith.constant 0 : i32
    %19 = vector.broadcast %c0_i32_12 : i32 to vector<8x16xi32>
    %20 = arith.cmpi slt, %16, %19 : vector<8x16xi32>
    %c0_i32_13 = arith.constant 0 : i32
    %21 = arith.cmpi slt, %14, %c0_i32_13 : i32
    %22 = vector.broadcast %21 : i1 to vector<8x16xi1>
    %23 = vector.broadcast %22 : vector<8x16xi1> to vector<8x16xi1>
    %24 = arith.xori %20, %23 : vector<8x16xi1>
    %25 = arith.andi %24, %18 : vector<8x16xi1>
    %26 = vector.broadcast %14 : i32 to vector<8x16xi32>
    %27 = arith.addi %16, %26 : vector<8x16xi32>
    %28 = arith.select %25, %27, %16 : vector<8x16xi1>, vector<8x16xi32>
    %c0_i32_14 = arith.constant 0 : i32
    %29 = vector.broadcast %c0_i32_14 : i32 to vector<8x16xi32>
    %30 = arith.cmpi eq, %28, %29 : vector<8x16xi32>
    %c1_i32_15 = arith.constant 1 : i32
    %31 = tpu.dynamic_rotate %11 by %c1_i32_15 dim 0 : vector<8x16xf32>, i32 -> vector<8x16xf32>
    %cst_16 = arith.constant 0.000000e+00 : f32
    %32 = vector.broadcast %cst_16 : f32 to vector<8x16xf32>
    %33 = arith.select %30, %32, %31 : vector<8x16xi1>, vector<8x16xf32>
    %c3_i32 = arith.constant 3 : i32
    %34 = vector.broadcast %c3_i32 : i32 to vector<8x16xi32>
    %35 = arith.cmpi eq, %28, %34 : vector<8x16xi32>
    %c7_i32 = arith.constant 7 : i32
    %36 = tpu.dynamic_rotate %11 by %c7_i32 dim 0 : vector<8x16xf32>, i32 -> vector<8x16xf32>
    %cst_17 = arith.constant 0.000000e+00 : f32
    %37 = vector.broadcast %cst_17 : f32 to vector<8x16xf32>
    %38 = arith.select %35, %37, %36 : vector<8x16xi1>, vector<8x16xf32>
    %39 = tpu.concatenate %33, %11, %38 in 1 : vector<8x16xf32>, vector<8x16xf32>, vector<8x16xf32> -> vector<8x48xf32>
    %c0_18 = arith.constant 0 : index
    %c0_19 = arith.constant 0 : index
    %40 = vector.load %arg3[%c0_18, %c0_19] : memref<48x32xf32, #tpu.memory_space<vmem>>, vector<48x32xf32>
    %cst_20 = arith.constant dense<0.000000e+00> : vector<8x32xf32>
    %41 = tpu.matmul %39, %40, %cst_20 {dimension_numbers = #tpu.dot_dimension_numbers<[1], [0], [0], [1], [0, 0, 1, 1], [], []>} : vector<8x48xf32>, vector<48x32xf32>, vector<8x32xf32> -> vector<8x32xf32>
    %c0_21 = arith.constant 0 : index
    %c0_22 = arith.constant 0 : index
    %42 = vector.load %arg4[%c0_21, %c0_22] : memref<1x32xf32, #tpu.memory_space<vmem>>, vector<1x32xf32>
    %43 = vector.broadcast %42 : vector<1x32xf32> to vector<8x32xf32>
    %44 = arith.addf %41, %43 : vector<8x32xf32>
    %cst_23 = arith.constant 0.000000e+00 : f32
    %45 = vector.broadcast %cst_23 : f32 to vector<8x32xf32>
    %46 = arith.maximumf %44, %45 : vector<8x32xf32>
    %c0_24 = arith.constant 0 : index
    %c0_25 = arith.constant 0 : index
    %47 = vector.load %arg11[%c0_24, %c0_25] : memref<8x32xf32, #tpu.memory_space<vmem>>, vector<8x32xf32>
    tpu.vector_store %arg11[%c0_24, %c0_25], %46 {strides = array<i32>} : memref<8x32xf32, #tpu.memory_space<vmem>>, vector<8x32xf32>,
    %c0_26 = arith.constant 0 : index
    %c0_27 = arith.constant 0 : index
    %48 = tpu.strided_load %arg11[%c0_26, %c0_27] {strides = array<i32: 4, 1>} : memref<8x32xf32, #tpu.memory_space<vmem>>, vector<2x32xf32>
    %c1_28 = arith.constant 1 : index
    %c0_29 = arith.constant 0 : index
    %49 = tpu.strided_load %arg11[%c1_28, %c0_29] {strides = array<i32: 4, 1>} : memref<8x32xf32, #tpu.memory_space<vmem>>, vector<2x32xf32>
    %50 = arith.maximumf %48, %49 : vector<2x32xf32>
    %c2 = arith.constant 2 : index
    %c0_30 = arith.constant 0 : index
    %51 = tpu.strided_load %arg11[%c2, %c0_30] {strides = array<i32: 4, 1>} : memref<8x32xf32, #tpu.memory_space<vmem>>, vector<2x32xf32>
    %c3 = arith.constant 3 : index
    %c0_31 = arith.constant 0 : index
    %52 = tpu.strided_load %arg11[%c3, %c0_31] {strides = array<i32: 4, 1>} : memref<8x32xf32, #tpu.memory_space<vmem>>, vector<2x32xf32>
    %53 = arith.maximumf %51, %52 : vector<2x32xf32>
    %54 = tpu.concatenate %50, %53 in 1 : vector<2x32xf32>, vector<2x32xf32> -> vector<2x64xf32>
    %c0_32 = arith.constant 0 : index
    %c0_33 = arith.constant 0 : index
    %55 = vector.load %arg5[%c0_32, %c0_33] : memref<64x64xf32, #tpu.memory_space<vmem>>, vector<64x64xf32>
    %cst_34 = arith.constant dense<0.000000e+00> : vector<2x64xf32>
    %56 = tpu.matmul %54, %55, %cst_34 {dimension_numbers = #tpu.dot_dimension_numbers<[1], [0], [0], [1], [0, 0, 1, 1], [], []>} : vector<2x64xf32>, vector<64x64xf32>, vector<2x64xf32> -> vector<2x64xf32>
    %c0_35 = arith.constant 0 : index
    %c0_36 = arith.constant 0 : index
    %57 = vector.load %arg6[%c0_35, %c0_36] : memref<1x64xf32, #tpu.memory_space<vmem>>, vector<1x64xf32>
    %58 = vector.broadcast %57 : vector<1x64xf32> to vector<2x64xf32>
    %59 = arith.addf %56, %58 : vector<2x64xf32>
    %cst_37 = arith.constant 0.000000e+00 : f32
    %60 = vector.broadcast %cst_37 : f32 to vector<2x64xf32>
    %61 = arith.maximumf %59, %60 : vector<2x64xf32>
    %c0_38 = arith.constant 0 : index
    %c0_39 = arith.constant 0 : index
    %62 = vector.load %arg7[%c0_38, %c0_39] : memref<64x1xf32, #tpu.memory_space<vmem>>, vector<64x1xf32>
    %cst_40 = arith.constant dense<0.000000e+00> : vector<2x1xf32>
    %63 = tpu.matmul %61, %62, %cst_40 {dimension_numbers = #tpu.dot_dimension_numbers<[1], [0], [0], [1], [0, 0, 1, 1], [], []>} : vector<2x64xf32>, vector<64x1xf32>, vector<2x1xf32> -> vector<2x1xf32>
    %c0_41 = arith.constant 0 : index
    %c0_42 = arith.constant 0 : index
    %64 = vector.load %arg8[%c0_41, %c0_42] : memref<1x1xf32, #tpu.memory_space<vmem>>, vector<1x1xf32>
    %65 = vector.broadcast %64 : vector<1x1xf32> to vector<2x1xf32>
    %66 = arith.addf %63, %65 : vector<2x1xf32>
    %c0_43 = arith.constant 0 : index
    %c0_44 = arith.constant 0 : index
    %67 = vector.load %arg9[%c0_43, %c0_44] : memref<2x1xf32, #tpu.memory_space<vmem>>, vector<2x1xf32>
    tpu.vector_store %arg9[%c0_43, %c0_44], %66 {strides = array<i32>} : memref<2x1xf32, #tpu.memory_space<vmem>>, vector<2x1xf32>,
    return
  }
}

</mosaic_0001>

<bundles_post_ra>
// kernel: cnn_forward.1
= control target key start
LH: loop header
LB: loop body
LE: loop exit
PB: predicated region body
PF: predicated region fallthrough
CT: control target
= control target key end

     0   :  { %vm51_vm0 = vcmask 1042432   ;;  %vm44_vm1 = vcmask 23552   ;;  %v591_v3 = vmov 0.0|0.0   ;;  %vm132_vm2 = vcmask 130048   ;;  %s760_s1 = inlined_call_operand.vmem [shape: f32[3,16], index: 1, kind: input, shape index: {}]   ;;  %s761_s0 = inlined_call_operand.vmem [shape: f32[16,3], index: 0, kind: input, shape index: {}]   ;;  %s762_s3 = inlined_call_operand.vmem [shape: f32[48,32], index: 3, kind: input, shape index: {}]   ;;  %s763_s2 = inlined_call_operand.vmem [shape: f32[1,16], index: 2, kind: input, shape index: {}]   ;;  %s764_s5 = inlined_call_operand.vmem [shape: f32[64,64], index: 5, kind: input, shape index: {}]   ;;  %s765_s4 = inlined_call_operand.vmem [shape: f32[1,32], index: 4, kind: input, shape index: {}]   ;;  %s766_s7 = inlined_call_operand.vmem [shape: f32[64,1], index: 7, kind: input, shape index: {}]   ;;  %s767_s8 = inlined_call_operand.<no memory space> [shape: f32[1,1], index: 8, kind: input, shape index: {}]   ;;  %s768_s6 = inlined_call_operand.vmem [shape: f32[1,64], index: 6, kind: input, shape index: {}]   ;;  %s769_s9 = inlined_call_operand.vmem [shape: f32[2,1], index: 9, kind: output, shape index: {}]  }
   0x1   :  { %v36_v0 = vld [vmem:[%s760_s1] sm:$0x7]  ;;  %v35_v2 = vld [vmem:[%s761_s0 + $0x8] sm:$0xff]  ;;  %553 = vmatprep.subr.bf16.mxu1 %v591_v3  ;;  %v172_v6 = vld [vmem:[%s762_s3 + $0x10] sm:$0xff]  ;;  %v139_v18 = vlaneseq  ;;  %vm592_vm3 = vmmov 0   ;;  %v593_v22 = vmov 0.0  }
   0x2   :  { %v34_v1 = vld [vmem:[%s761_s0] sm:$0xff]  ;;  %495 = vmatprep.subr.msk.mxu0 %vm51_vm0, %v36_v0  ;;  %v171_v5 = vld [vmem:[%s762_s3 + $0x8] sm:$0xff]  ;;  %v173_v8 = vld [vmem:[%s762_s3 + $0x18] sm:$0xff]  ;;  %512 = vmatprep.mubr.msk.f32.mxu1 %vm592_vm3, %v593_v22  ;;  %vm168_vm6 = vcmask 261120   ;;  %vm183_vm7 = vcmask 392192   ;;  %vm288_vm8 = vcmask 523264  }
   0x3   :  { %497 = vmatprep.mubr.msk.f32.mxu0 %vm44_vm1, %v34_v1  ;;  %496 = vmatpush3.msk.msra.mxu0 %vm51_vm0, %v36_v0  ;;  %v170_v4 = vld [vmem:[%s762_s3] sm:$0xff]  ;;  %v557_v9 = vpack.c.bf16 %v173_v8, %v172_v6  ;;  %v175_v16 = vld [vmem:[%s762_s3 + $0x28] sm:$0xff]  ;;  %v140_v21 = vshrl.u32 %v139_v18, 7  ;;  %v275_v37 = vld [vmem:[%s764_s5 + $0x10] sm:$0xff]  ;;  %vm451_vm9 = vcmask 1024  }
   0x4   :  { %498 = vmatmul.mubr.msk.f32.vlgmr.msra.gmra.mrb[0].mxu0 %vm44_vm1, %v35_v2  ;;  %562 = vmatprep.subr.bf16.mxu0 %v591_v3  ;;  %v554_v7 = vpack.c.bf16 %v171_v5, %v170_v4  ;;  %v457_v10 = vld [vmem:[%s763_s2] ss:$0 sm:$0xff]  ;;  %s594_s2 = smov 16   ;;  %v274_v36 = vld [vmem:[%s764_s5 + $0x8] sm:$0xff]  ;;  %v276_v39 = vld [vmem:[%s764_s5 + $0x18] sm:$0xff] }
   0x5   :  { %v174_v15 = vld [vmem:[%s762_s3 + $0x20] sm:$0xff]  ;;  %531 = vmatprep.mubr.msk.f32.mxu0 %vm592_vm3, %v593_v22  ;;  %v145_v23 = vand.u32 3, %v140_v21  ;;  %s595_s3 = smov 32   ;;  %v566_v40 = vpack.c.bf16 %v276_v39, %v275_v37  ;;  %v278_v42 = vld [vmem:[%s764_s5 + $0x28] sm:$0xff]  ;;  %v279_v44 = vld [vmem:[%s764_s5 + $0x30] sm:$0xff] }
   0x6   :  { %555 = vmatpush3.bf16.msra.mxu1 %v554_v7  ;;  %v560_v19 = vpack.c.bf16 %v175_v16, %v174_v15  ;;  %v273_v35 = vld [vmem:[%s764_s5] sm:$0xff]  ;;  %v280_v45 = vld [vmem:[%s764_s5 + $0x38] sm:$0xff]  ;;  %v364_v53 = vld [vmem:[%s766_s7 + $0x8] sm:$0xff] }
   0x7   :  { %556 = vmatprep.subr.bf16.mxu1 %v591_v3  ;;  %vm156_vm4 = vcmp.eq.s32.totalorder %v145_v23, 3  ;;  %vm153_vm5 = vcmp.eq.s32.totalorder %v145_v23, 0  ;;  %v563_v38 = vpack.c.bf16 %v274_v36, %v273_v35  ;;  %v277_v41 = vld [vmem:[%s764_s5 + $0x20] sm:$0xff]  ;;  %v572_v46 = vpack.c.bf16 %v280_v45, %v279_v44  ;;  %v365_v54 = vld [vmem:[%s766_s7 + $0x10] sm:$0xff]  ;;  %v366_v56 = vld [vmem:[%s766_s7 + $0x18] sm:$0xff] }
   0x8   :  { %v569_v43 = vpack.c.bf16 %v278_v42, %v277_v41  ;;  %v461_v47 = vld [vmem:[%s765_s4] ss:$0 sm:$0xff]  ;;  %v578_v57 = vpack.c.bf16 %v366_v56, %v365_v54  ;;  %v368_v59 = vld [vmem:[%s766_s7 + $0x28] sm:$0xff]  ;;  %v369_v6 = vld [vmem:[%s766_s7 + $0x30] sm:$0xff] }
   0x9   :  { %564 = vmatpush3.bf16.msra.mxu0 %v563_v38  ;;  %v363_v52 = vld [vmem:[%s766_s7] sm:$0xff]  ;;  %v370_v7 = vld [vmem:[%s766_s7 + $0x38] sm:$0xff] }
   0xa   :  { %558 = vmatpush3.bf16.msra.mxu1 %v557_v9  ;;  %565 = vmatprep.subr.bf16.mxu0 %v591_v3  ;;  %v575_v55 = vpack.c.bf16 %v364_v53, %v363_v52  ;;  %v367_v58 = vld [vmem:[%s766_s7 + $0x20] sm:$0xff]  ;;  %v584_v8 = vpack.c.bf16 %v370_v7, %v369_v6 }
   0xb   :  { %559 = vmatprep.subr.bf16.mxu1 %v591_v3  ;;  %v581_v60 = vpack.c.bf16 %v368_v59, %v367_v58  ;;  %v463_v9 = vld [vmem:[%s768_s6] ss:$0 sm:$0xff] }
   0xd   :  { %567 = vmatpush3.bf16.msra.mxu0 %v566_v40 }
   0xe   :  { %561 = vmatpush3.bf16.msra.mxu1 %v560_v19  ;;  %568 = vmatprep.subr.bf16.mxu0 %v591_v3 }
   0xf   :  { %574 = vmatprep.subr.bf16.mxu1 %v591_v3 }
  0x11   :  { %570 = vmatpush3.bf16.msra.mxu0 %v569_v43 }
  0x12   :  { %571 = vmatprep.subr.bf16.mxu0 %v591_v3 }
  0x15   :  { %573 = vmatpush3.bf16.msra.mxu0 %v572_v46 }
  0xd7   :  { %v499_v11 = vpop.f32.mrb[0].mxu0 }
  0xd8   :  { %v127_v12 = vadd.f32 %v499_v11, %v457_v10  ;;  %v121_v13 = vpop.f32.mrb[1].mxu0 }
  0xd9   :  { %v122_v14 = vadd.f32 %v457_v10, %v121_v13 }
  0xda   :  { %v131_v17 = vmax.f32 %v127_v12, 0.0 }
  0xdb   :  { %v130_v20 = vmax.f32 %v122_v14, 0.0 }
  0xdc   :  { %134 = vst.msk [vmem:[#allocation2 + $0x8] sm:$0xff] %vm132_vm2, %v131_v17 }
  0xdd   :  { %133 = vst.msk [vmem:[#allocation2] sm:$0xff] %vm132_vm2, %v130_v20 }
  0xe4   :  { %v135_v24 = vld [vmem:[#allocation2] ss:$2 sm:$0xff]  ;;  %v137_v25 = vld [vmem:[#allocation2 + $0x1] ss:$2 sm:$0xff] }
  0xe5   :  { %v138_v26 = vmax.f32 %v135_v24, %v137_v25 }
  0xe7   :  { %160 = vrot.lane.b32.xlu0 %v138_v26, %s594_s2  ;;  %v157_v27 = vrot.slane %v138_v26, 1  ;;  %v154_v28 = vrot.slane %v138_v26, 7 }
  0xe9   :  { %v158_v29 = vsel %vm156_vm4, 0.0, %v157_v27  ;;  %v155_v30 = vsel %vm153_vm5, 0.0, %v154_v28 }
  0xeb   :  { %164 = vrot.lane.b32.xlu0 %v158_v29, %s595_s3 }
 0x159   :  { %v161_v31 = vpop.permute.xlu0 %160 }
 0x15a   :  { %v167_v32 = vsel %vm132_vm2, %v155_v30, %v161_v31 }
 0x15d   :  { %v165_v33 = vpop.permute.xlu0 %164 }
 0x15e   :  { %v169_v34 = vsel %vm168_vm6, %v167_v32, %v165_v33 }
 0x15f   :  { %513 = vmatmul.mubr.msk.f32.vlgmr.msra.gmra.mrb[0].mxu1 %vm183_vm7, %v169_v34 }
 0x160   :  { %550 = vmatprep.mubr.msk.f32.mxu1 %vm592_vm3, %v593_v22  ;;  %576 = vmatpush3.bf16.msra.mxu1 %v575_v55 }
 0x161   :  { %577 = vmatprep.subr.bf16.mxu1 %v591_v3 }
 0x164   :  { %579 = vmatpush3.bf16.msra.mxu1 %v578_v57 }
 0x165   :  { %580 = vmatprep.subr.bf16.mxu1 %v591_v3 }
 0x168   :  { %582 = vmatpush3.bf16.msra.mxu1 %v581_v60 }
 0x169   :  { %583 = vmatprep.subr.bf16.mxu1 %v591_v3  ;;  %v14_v3 = vstv %s767_s8 }
 0x16a   :  { %15 = vst [vmem:[#allocation4] sm:$0x1] %v14_v3 }
 0x16c   :  { %585 = vmatpush3.bf16.msra.mxu1 %v584_v8 }
 0x171   :  { %v465_v14 = vld [vmem:[#allocation4] ss:$0 sm:$0xff] }
 0x232   :  { %v253_v48 = vpop.f32.mrb[0].mxu1 }
 0x233   :  { %v254_v49 = vadd.f32 %v461_v47, %v253_v48  ;;  %v514_v50 = vpop.f32.mrb[1].mxu1 }
 0x235   :  { %v257_v51 = vmax.f32 %v254_v49, 0.0 }
 0x237   :  { %258 = vst.msk [vmem:[#allocation3] sm:$0xff] %vm168_vm6, %v257_v51 }
 0x23e   :  { %v264_v61 = vld [vmem:[#allocation3 + $0x2] ss:$4 sm:$0x3]  ;;  %v266_v62 = vld [vmem:[#allocation3 + $0x3] ss:$4 sm:$0x3] }
 0x23f   :  { %v267_v63 = vmax.f32 %v264_v61, %v266_v62  ;;  %v259_v0 = vld [vmem:[#allocation3] ss:$4 sm:$0x3]  ;;  %v261_v1 = vld [vmem:[#allocation3 + $0x1] ss:$4 sm:$0x3] }
 0x240   :  { %v262_v2 = vmax.f32 %v259_v0, %v261_v1 }
 0x241   :  { %269 = vrot.lane.b32.xlu1 %v267_v63, %s595_s3 }
 0x2b3   :  { %v270_v4 = vpop.permute.xlu1 %269 }
 0x2b4   :  { %v272_v5 = vsel %vm168_vm6, %v262_v2, %v270_v4 }
 0x2b5   :  { %532 = vmatmul.mubr.msk.f32.vlgmr.msra.gmra.mrb[2].mxu0 %vm288_vm8, %v272_v5 }
 0x388   :  { %v358_v10 = vpop.f32.mrb[2].mxu0 }
 0x389   :  { %v359_v11 = vadd.f32 %v463_v9, %v358_v10  ;;  %v533_v12 = vpop.f32.mrb[3].mxu0 }
 0x38b   :  { %v362_v13 = vmax.f32 %v359_v11, 0.0 }
 0x38d   :  { %551 = vmatmul.mubr.msk.f32.vlgmr.msra.gmra.mrb[2].mxu1 %vm288_vm8, %v362_v13 }
 0x460   :  { %v447_v15 = vpop.f32.mrb[2].mxu1 }
 0x461   :  { %v448_v16 = vadd.f32 %v465_v14, %v447_v15  ;;  %v552_v17 = vpop.f32.mrb[3].mxu1 }
 0x463   :  { %452 = vst.msk [vmem:[%s769_s9] sm:$0x3] %vm451_vm9, %v448_v16 }

</bundles_post_ra>
